<compile_context>
chip_gen: v5e
topology: v5e:2x2
jax: 0.10.0
libtpu: 0.0.40
codegen_flags: <defaults>
</compile_context>

<pallas_src>
import jax
import jax.numpy as jnp
from jax import lax
from jax.experimental import pallas as pl
from jax.experimental.pallas import tpu as pltpu


def _round_up(x, m):
    return ((x + m - 1) // m) * m


def nn_forward_kernel(x_ref, wc_ref, bc_ref, wf_ref, bf_ref, o_ref):
    # x_ref : (TM, K)     -- one batch tile of the flattened NCHW input (native dtype)
    # wc_ref: (K, 64)     -- conv weight as matmul
    # bc_ref: (1, 64) f32 -- conv bias
    # wf_ref: (4, 64) f32 -- fc weight (PyTorch layout, used transposed via dot_general)
    # bf_ref: (4, 1)  f32 -- fc bias (column vector for the transposed output)
    # o_ref : (4, TM) f32 -- lane-dense transposed output tile
    h = jnp.dot(x_ref[...], wc_ref[...], preferred_element_type=jnp.float32)
    h = jnp.maximum(h + bc_ref[...], 0.0)                     # ReLU, f32
    # Dropout(0.5): identity in eval mode.
    # y_t[n, m] = sum_k wf[n, k] * h[m, k]  -> (4, TM), lane dim = TM (dense stores)
    y_t = lax.dot_general(
        wf_ref[...], h,
        dimension_numbers=(((1,), (1,)), ((), ())),
        preferred_element_type=jnp.float32,
    )
    o_ref[...] = (y_t + bf_ref[...]).astype(o_ref.dtype)


def prepare_nn_params(conv_w, conv_b, fc_w, fc_b, compute_dtype=jnp.float32):
    """One-time parameter preprocessing (do NOT call per forward pass).

    conv_w : (64, C, H, W)  PyTorch conv weight
    conv_b : (64,)
    fc_w   : (4, 64)        PyTorch linear weight (out_features x in_features)
    fc_b   : (4,)
    compute_dtype : dtype for the conv weight; match the producer's x dtype
                    (f32 by default; bf16 if the producer emits bf16 activations).
    """
    n_out, C, H, W = conv_w.shape
    K = C * H * W
    wc = conv_w.reshape(n_out, K).T.astype(compute_dtype)       # (K, 64), no K padding
    bc = conv_b.reshape(1, n_out).astype(jnp.float32)           # (1, 64)
    wf = fc_w.astype(jnp.float32)                               # (4, 64)
    bf_t = fc_b.reshape(-1, 1).astype(jnp.float32)              # (4, 1)
    return wc, bc, wf, bf_t


def _choose_tm(B, tm_max=4096, tm_min=128):
    """Pick the batch tile size.

    - Small batches: one tile, rounded to 16 rows.
    - Large batches: >= 2 tiles (so the 'parallel' grid axis engages both TCs on v7x),
      tiles a multiple of 128 and capped near cdiv(B, n_tiles) to bound padding waste.
    """
    B16 = _round_up(B, 16)
    if B16 <= 2 * tm_min:
        return B16
    n_tiles = max(2, pl.cdiv(B, tm_max))
    tm = _round_up(pl.cdiv(B, n_tiles), tm_min)
    return min(tm, tm_max)


def nn_forward(x_nchw, params, tm_max=4096):
    """Forward pass. x_nchw: (B, C, H, W) with H == W == agent_see, C == in_dim*3.

    x is consumed in its native dtype (f32 or bf16) -- no cast/pad pass over x.
    Returns (B, 4) float32.
    """
    wc, bc, wf, bf_t = params
    K, n_hidden = wc.shape
    n_out = wf.shape[0]
    B, C, H, W = x_nchw.shape
    assert C * H * W == K, "input feature size does not match prepared conv weight"

    TM = _choose_tm(B, tm_max=tm_max)
    B_pad = _round_up(B, TM)

    # Flatten (free reshape of a contiguous array). Pad the batch dim only if needed;
    # padded rows are sliced off after the kernel.
    x2d = x_nchw.reshape(B, K)
    if B_pad != B:
        x2d = jnp.pad(x2d, ((0, B_pad - B), (0, 0)))

    # Advisory cost estimate: memory-bound streaming matmul (lets XLA overlap neighbors).
    bytes_accessed = (
        B_pad * K * x2d.dtype.itemsize
        + K * n_hidden * wc.dtype.itemsize
        + (bc.size + wf.size + bf_t.size) * 4
        + n_out * B_pad * 4
    )
    cost = pl.CostEstimate(
        flops=2 * B_pad * (K * n_hidden + n_hidden * n_out),
        transcendentals=0,
        bytes_accessed=bytes_accessed,
    )

    out_t = pl.pallas_call(
        nn_forward_kernel,
        out_shape=jax.ShapeDtypeStruct((n_out, B_pad), jnp.float32),
        grid=(B_pad // TM,),
        in_specs=[
            pl.BlockSpec((TM, K), lambda i: (i, 0)),           # streamed batch tile (K = full dim)
            pl.BlockSpec((K, n_hidden), lambda i: (0, 0)),     # VMEM-resident weights/biases
            pl.BlockSpec((1, n_hidden), lambda i: (0, 0)),
            pl.BlockSpec((n_out, n_hidden), lambda i: (0, 0)),
            pl.BlockSpec((n_out, 1), lambda i: (0, 0)),
        ],
        out_specs=pl.BlockSpec((n_out, TM), lambda i: (0, i)),  # lane-dense transposed output
        compiler_params=pltpu.CompilerParams(
            dimension_semantics=("parallel",),                  # shard batch tiles across TCs (v7x)
        ),
        cost_estimate=cost,
    )(x2d, wc, bc, wf, bf_t)

    return out_t[:, :B].T                                       # (B, 4)


if __name__ == "__main__":
    # Small shapes consistent with the module: in_dim=4, agent_see=5
    in_dim = 4
    agent_see = 5
    B = 2
    C = in_dim * 3                    # conv in-channels
    H = W = agent_see                 # full-spatial conv kernel -> 1x1 output

    key = jax.random.PRNGKey(0)
    kx, kcw, kcb, kfw, kfb = jax.random.split(key, 5)

    x = jax.random.normal(kx, (B, C, H, W), dtype=jnp.float32)

    # Deterministic parameter init (synthetic, PyTorch-like fan-in scaling).
    fan_in_conv = C * H * W
    conv_w = jax.random.uniform(kcw, (64, C, H, W), jnp.float32,
                                -1.0, 1.0) / jnp.sqrt(fan_in_conv)
    conv_b = jax.random.uniform(kcb, (64,), jnp.float32,
                                -1.0, 1.0) / jnp.sqrt(fan_in_conv)
    fc_w = jax.random.uniform(kfw, (4, 64), jnp.float32, -1.0, 1.0) / jnp.sqrt(64.0)
    fc_b = jax.random.uniform(kfb, (4,), jnp.float32, -1.0, 1.0) / jnp.sqrt(64.0)

    params = prepare_nn_params(conv_w, conv_b, fc_w, fc_b)   # one-time weight prep
    out = nn_forward(x, params)
    jax.block_until_ready(out)

    # Reference check in plain JAX f32 (conv-as-matmul + relu + linear).
    ref_h = jnp.maximum(x.reshape(B, -1) @ conv_w.reshape(64, -1).T + conv_b, 0.0)
    ref = ref_h @ fc_w.T + fc_b
    assert out.shape == (B, 4)
    # MXU default precision for f32 matmuls -> modest tolerance vs the f32 reference.
    assert jnp.allclose(out, ref, atol=1e-2, rtol=1e-2), float(jnp.max(jnp.abs(out - ref)))

    print("KERNEL_OK")
</pallas_src>

<mosaic_0001>
module attributes {stable_mosaic.version = 11 : i64} {
  func.func @nn_forward_kernel(%arg0: i32, %arg1: memref<16x300xf32, #tpu.memory_space<vmem>>, %arg2: memref<300x64xf32, #tpu.memory_space<vmem>>, %arg3: memref<1x64xf32, #tpu.memory_space<vmem>>, %arg4: memref<4x64xf32, #tpu.memory_space<vmem>>, %arg5: memref<4x1xf32, #tpu.memory_space<vmem>>, %arg6: memref<4x16xf32, #tpu.memory_space<vmem>>) attributes {dimension_semantics = [#tpu.dimension_semantics<parallel>], iteration_bounds = array<i64: 1>, scalar_prefetch = 0 : i64, scratch_operands = 0 : i64, tpu.core_type = #tpu.core_type<tc>, window_params = [{transform_indices = @transform_0, window_bounds = array<i64: 16, 300>}, {pipeline_mode = #tpu.pipeline_mode<synchronous>, transform_indices = @transform_1, window_bounds = array<i64: 300, 64>}, {pipeline_mode = #tpu.pipeline_mode<synchronous>, transform_indices = @transform_2, window_bounds = array<i64: 1, 64>}, {pipeline_mode = #tpu.pipeline_mode<synchronous>, transform_indices = @transform_3, window_bounds = array<i64: 4, 64>}, {pipeline_mode = #tpu.pipeline_mode<synchronous>, transform_indices = @transform_4, window_bounds = array<i64: 4, 1>}, {transform_indices = @transform_5, window_bounds = array<i64: 4, 16>}]} {
    %c0 = arith.constant 0 : index
    %c0_0 = arith.constant 0 : index
    %0 = vector.load %arg1[%c0, %c0_0] : memref<16x300xf32, #tpu.memory_space<vmem>>, vector<16x300xf32>
    %c0_1 = arith.constant 0 : index
    %c0_2 = arith.constant 0 : index
    %1 = vector.load %arg2[%c0_1, %c0_2] : memref<300x64xf32, #tpu.memory_space<vmem>>, vector<300x64xf32>
    %cst = arith.constant dense<0.000000e+00> : vector<16x64xf32>
    %2 = tpu.matmul %0, %1, %cst {dimension_numbers = #tpu.dot_dimension_numbers<[1], [0], [0], [1], [0, 0, 1, 1], [], []>} : vector<16x300xf32>, vector<300x64xf32>, vector<16x64xf32> -> vector<16x64xf32>
    %c0_3 = arith.constant 0 : index
    %c0_4 = arith.constant 0 : index
    %3 = vector.load %arg3[%c0_3, %c0_4] : memref<1x64xf32, #tpu.memory_space<vmem>>, vector<1x64xf32>
    %4 = vector.broadcast %3 : vector<1x64xf32> to vector<16x64xf32>
    %5 = arith.addf %2, %4 : vector<16x64xf32>
    %cst_5 = arith.constant 0.000000e+00 : f32
    %6 = vector.broadcast %cst_5 : f32 to vector<16x64xf32>
    %7 = arith.maximumf %5, %6 : vector<16x64xf32>
    %c0_6 = arith.constant 0 : index
    %c0_7 = arith.constant 0 : index
    %8 = vector.load %arg4[%c0_6, %c0_7] : memref<4x64xf32, #tpu.memory_space<vmem>>, vector<4x64xf32>
    %cst_8 = arith.constant dense<0.000000e+00> : vector<4x16xf32>
    %9 = tpu.matmul %8, %7, %cst_8 {dimension_numbers = #tpu.dot_dimension_numbers<[1], [1], [0], [0], [0, 0, 1, 0], [], []>} : vector<4x64xf32>, vector<16x64xf32>, vector<4x16xf32> -> vector<4x16xf32>
    %c0_9 = arith.constant 0 : index
    %c0_10 = arith.constant 0 : index
    %10 = vector.load %arg5[%c0_9, %c0_10] : memref<4x1xf32, #tpu.memory_space<vmem>>, vector<4x1xf32>
    %11 = vector.broadcast %10 : vector<4x1xf32> to vector<4x16xf32>
    %12 = arith.addf %9, %11 : vector<4x16xf32>
    %c0_11 = arith.constant 0 : index
    %c0_12 = arith.constant 0 : index
    %13 = vector.load %arg6[%c0_11, %c0_12] : memref<4x16xf32, #tpu.memory_space<vmem>>, vector<4x16xf32>
    tpu.vector_store %arg6[%c0_11, %c0_12], %12 {strides = array<i32>} : memref<4x16xf32, #tpu.memory_space<vmem>>, vector<4x16xf32>,
    return
  }
  func.func @transform_0(%arg0: i32) -> (i32, i32) {
    %c0_i32 = arith.constant 0 : i32
    %c0_i32_0 = arith.constant 0 : i32
    return %arg0, %c0_i32 : i32, i32
  }
  func.func @transform_1(%arg0: i32) -> (i32, i32) {
    %c0_i32 = arith.constant 0 : i32
    %c0_i32_0 = arith.constant 0 : i32
    %c0_i32_1 = arith.constant 0 : i32
    return %c0_i32, %c0_i32_0 : i32, i32
  }
  func.func @transform_2(%arg0: i32) -> (i32, i32) {
    %c0_i32 = arith.constant 0 : i32
    %c0_i32_0 = arith.constant 0 : i32
    %c0_i32_1 = arith.constant 0 : i32
    return %c0_i32, %c0_i32_0 : i32, i32
  }
  func.func @transform_3(%arg0: i32) -> (i32, i32) {
    %c0_i32 = arith.constant 0 : i32
    %c0_i32_0 = arith.constant 0 : i32
    %c0_i32_1 = arith.constant 0 : i32
    return %c0_i32, %c0_i32_0 : i32, i32
  }
  func.func @transform_4(%arg0: i32) -> (i32, i32) {
    %c0_i32 = arith.constant 0 : i32
    %c0_i32_0 = arith.constant 0 : i32
    %c0_i32_1 = arith.constant 0 : i32
    return %c0_i32, %c0_i32_0 : i32, i32
  }
  func.func @transform_5(%arg0: i32) -> (i32, i32) {
    %c0_i32 = arith.constant 0 : i32
    %c0_i32_0 = arith.constant 0 : i32
    return %c0_i32, %arg0 : i32, i32
  }
}

</mosaic_0001>

<bundles_post_ra>
// kernel: tpu_custom_call.1
= control target key start
LH: loop header
LB: loop body
LE: loop exit
PB: predicated region body
PF: predicated region fallthrough
CT: control target
= control target key end

     0   :  { %vm76_vm0 = vcmask 1043456   ;;  %s420_s0 = inlined_call_operand.vmem [shape: f32[16,300], index: 0, kind: input, shape index: {}]   ;;  %s421_s1 = inlined_call_operand.vmem [shape: f32[300,64], index: 1, kind: input, shape index: {}]   ;;  %s422_s2 = inlined_call_operand.vmem [shape: f32[1,64], index: 2, kind: input, shape index: {}]   ;;  %s423_s3 = inlined_call_operand.vmem [shape: f32[4,64], index: 3, kind: input, shape index: {}]   ;;  %s424_s4 = inlined_call_operand.vmem [shape: f32[4,1], index: 4, kind: input, shape index: {}]   ;;  %s425_s5 = inlined_call_operand.hbm [shape: f32[4,16], index: 5, kind: output, shape index: {}]  }
   0x1   :  { %v42_v0 = vld [vmem:[%s421_s1 + $0x78] sm:$0xff]  ;;  %v41_v1 = vld [vmem:[%s421_s1 + $0x70] sm:$0xff]  ;;  %v40_v4 = vld [vmem:[%s421_s1 + $0x68] sm:$0xff] }
   0x2   :  { %v58_v2 = vld [vmem:[%s421_s1 + $0xf8] sm:$0xff]  ;;  %80 = vmatpush.msra.mxu0 %v42_v0  ;;  %v57_v3 = vld [vmem:[%s421_s1 + $0xf0] sm:$0xff]  ;;  %v56_v5 = vld [vmem:[%s421_s1 + $0xe8] sm:$0xff] }
   0x3   :  { %103 = vmatpush.msra.mxu1 %v58_v2  ;;  %v39_v6 = vld [vmem:[%s421_s1 + $0x60] sm:$0xff]  ;;  %v38_v8 = vld [vmem:[%s421_s1 + $0x58] sm:$0xff]  ;;  %v64_v10 = vld [vmem:[%s421_s1 + $0x128] sm:$0xf] }
   0x4   :  { %81 = vmatpush.msra.mxu0 %v41_v1  ;;  %v55_v7 = vld [vmem:[%s421_s1 + $0xe0] sm:$0xff]  ;;  %v54_v9 = vld [vmem:[%s421_s1 + $0xd8] sm:$0xff]  ;;  %v37_v12 = vld [vmem:[%s421_s1 + $0x50] sm:$0xff]  ;;  %206 = vmatpush.msk.msra.mxu2 %vm76_vm0, %v64_v10 }
   0x5   :  { %104 = vmatpush.msra.mxu1 %v57_v3  ;;  %v63_v11 = vld [vmem:[%s421_s1 + $0x120] sm:$0xff]  ;;  %v53_v13 = vld [vmem:[%s421_s1 + $0xd0] sm:$0xff]  ;;  %v62_v14 = vld [vmem:[%s421_s1 + $0x118] sm:$0xff] }
   0x6   :  { %82 = vmatpush.msra.mxu0 %v40_v4  ;;  %v36_v15 = vld [vmem:[%s421_s1 + $0x48] sm:$0xff]  ;;  %137 = vmatpush.msra.mxu2 %v63_v11  ;;  %v61_v17 = vld [vmem:[%s421_s1 + $0x110] sm:$0xff]  ;;  %v35_v18 = vld [vmem:[%s421_s1 + $0x40] sm:$0xff] }
   0x7   :  { %105 = vmatpush.msra.mxu1 %v56_v5  ;;  %v52_v16 = vld [vmem:[%s421_s1 + $0xc8] sm:$0xff]  ;;  %v51_v19 = vld [vmem:[%s421_s1 + $0xc0] sm:$0xff]  ;;  %v34_v21 = vld [vmem:[%s421_s1 + $0x38] sm:$0xff] }
   0x8   :  { %83 = vmatpush.msra.mxu0 %v39_v6  ;;  %138 = vmatpush.msra.mxu2 %v62_v14  ;;  %v60_v20 = vld [vmem:[%s421_s1 + $0x108] sm:$0xff]  ;;  %v50_v22 = vld [vmem:[%s421_s1 + $0xb8] sm:$0xff]  ;;  %v59_v23 = vld [vmem:[%s421_s1 + $0x100] sm:$0xff] }
   0x9   :  { %106 = vmatpush.msra.mxu1 %v55_v7 }
   0xa   :  { %84 = vmatpush.msra.mxu0 %v38_v8  ;;  %139 = vmatpush.msra.mxu2 %v61_v17 }
   0xb   :  { %107 = vmatpush.msra.mxu1 %v54_v9 }
   0xc   :  { %85 = vmatpush.msra.mxu0 %v37_v12 }
   0xd   :  { %108 = vmatpush.msra.mxu1 %v53_v13 }
   0xe   :  { %86 = vmatpush.msra.mxu0 %v36_v15 }
   0xf   :  { %109 = vmatpush.msra.mxu1 %v52_v16 }
  0x10   :  { %87 = vmatpush.msra.mxu0 %v35_v18 }
  0x11   :  { %110 = vmatpush.msra.mxu1 %v51_v19 }
  0x12   :  { %10 = vsyncpa [#allocation3], 0  ;;  %v33_v24 = vld [vmem:[%s421_s1 + $0x30] sm:$0xff]  ;;  %140 = vmatpush.msra.mxu2 %v60_v20  ;;  %88 = vmatpush.msra.mxu0 %v34_v21  ;;  %vm69_vm1 = vcmask 359424   ;;  %v32_v27 = vld [vmem:[%s421_s1 + $0x28] sm:$0xff]  ;;  %v242_v45 = vmov 0  }
  0x13   :  { %v49_v25 = vld [vmem:[%s421_s1 + $0xb0] sm:$0xff]  ;;  %111 = vmatpush.msra.mxu1 %v50_v22  ;;  %v48_v28 = vld [vmem:[%s421_s1 + $0xa8] sm:$0xff]  ;;  %v31_v29 = vld [vmem:[%s421_s1 + $0x20] sm:$0xff]  ;;  %214 = vset.pattern.permute.xlu0 %v242_v45  ;;  %vm158_vm2 = vcmask 523264   ;;  %s197_s12 = sshll.u32 %s425_s5, 4  ;;  %vm188_vm3 = vcmask 125952   ;;  %s198_s12 = int_to_ptr.hbm [resolvable:$true] %s197_s12 }
  0x14   :  { %v23_v26 = vld [vmem:[%s420_s0 + $0x10] sm:$0xff]  ;;  %141 = vmatpush.msra.mxu2 %v59_v23  ;;  %89 = vmatpush.msra.mxu0 %v33_v24  ;;  %v47_v30 = vld [vmem:[%s421_s1 + $0xa0] sm:$0xff]  ;;  %v30_v31 = vld [vmem:[%s421_s1 + $0x18] sm:$0xff] }
  0x15   :  { %112 = vmatpush.msra.mxu1 %v49_v25  ;;  %207 = vmatmul.msk.f32.vlgmr.msra.gmra.mxu2 %vm69_vm1, %v23_v26  ;;  %v46_v32 = vld [vmem:[%s421_s1 + $0x98] sm:$0xff]  ;;  %v29_v33 = vld [vmem:[%s421_s1 + $0x10] sm:$0xff]  ;;  %v26_v35 = vld [vmem:[%s420_s0 + $0x28] sm:$0xff] }
  0x16   :  { %90 = vmatpush.msra.mxu0 %v32_v27  ;;  %v45_v34 = vld [vmem:[%s421_s1 + $0x90] sm:$0xff]  ;;  %v28_v36 = vld [vmem:[%s421_s1 + $0x8] sm:$0xff]  ;;  %v27_v38 = vld [vmem:[%s421_s1] sm:$0xff] }
  0x17   :  { %113 = vmatpush.msra.mxu1 %v48_v28  ;;  %v44_v37 = vld [vmem:[%s421_s1 + $0x88] sm:$0xff]  ;;  %v43_v39 = vld [vmem:[%s421_s1 + $0x80] sm:$0xff]  ;;  %v24_v42 = vld [vmem:[%s420_s0 + $0x18] sm:$0xff] }
  0x18   :  { %91 = vmatpush.msra.mxu0 %v31_v29  ;;  %v21_v40 = vld [vmem:[%s420_s0] sm:$0xff]  ;;  %v22_v41 = vld [vmem:[%s420_s0 + $0x8] sm:$0xff] }
  0x19   :  { %114 = vmatpush.msra.mxu1 %v47_v30  ;;  %v25_v43 = vld [vmem:[%s420_s0 + $0x20] sm:$0xff] }
  0x1a   :  { %92 = vmatpush.msra.mxu0 %v30_v31  ;;  %v152_v44 = vld [vmem:[%s424_s4] sm:$0xf] }
  0x1b   :  { %115 = vmatpush.msra.mxu1 %v46_v32  ;;  %155 = vperm.xlu0 %214, %v152_v44   ;;  %v215_v49 = vld [vmem:[%s422_s2] ss:$0 sm:$0xff]  ;;  %s243_s2 = smov [#allocation2]  }
  0x1c   :  { %93 = vmatpush.msra.mxu0 %v29_v33  ;;  %v151_v61 = vld [vmem:[%s423_s3] sm:$0xf]  ;;  %s195_s9 = sshll.u32 %s243_s2, 4  ;;  %s196_s9 = int_to_ptr.vmem [resolvable:$true] %s195_s9 }
  0x1d   :  { %116 = vmatpush.msra.mxu1 %v45_v34  ;;  %208 = vmatmul.msk.f32.gmra.mxu2 %vm69_vm1, %v26_v35 }
  0x1e   :  { %94 = vmatpush.msra.mxu0 %v28_v36 }
  0x1f   :  { %117 = vmatpush.msra.mxu1 %v44_v37 }
  0x20   :  { %95 = vmatpush.msra.mxu0 %v27_v38 }
  0x21   :  { %118 = vmatpush.msra.mxu1 %v43_v39  ;;  %96 = vmatmul.f32.vlgmr.msra.gmra.mxu0 %v21_v40 }
  0x22   :  { %119 = vmatmul.f32.vlgmr.msra.gmra.mxu1 %v22_v41 }
  0x29   :  { %99 = vmatmul.f32.gmra.mxu0 %v24_v42 }
  0x2a   :  { %122 = vmatmul.f32.gmra.mxu1 %v25_v43 }
  0x8d   :  { %v156_v62 = vpop.permute.xlu0 %155 }
  0x98   :  { %v143_v46 = vpop.f32.mrf.mxu2 }
  0x9e   :  { %v97_v47 = vpop.f32.mrf.mxu0 }
  0x9f   :  { %v120_v48 = vpop.f32.mrf.mxu1  ;;  %v98_v50 = vadd.f32 %v215_v49, %v97_v47 }
  0xa0   :  { %v146_v54 = vpop.f32.mrf.mxu2 }
  0xa1   :  { %v121_v55 = vadd.f32 %v120_v48, %v98_v50 }
  0xa3   :  { %v144_v58 = vadd.f32 %v143_v46, %v121_v55 }
  0xa5   :  { %v149_v60 = vmax.f32 %v144_v58, 0.0 }
  0xa6   :  { %v100_v51 = vpop.f32.mrf.mxu0 }
  0xa7   :  { %v123_v52 = vpop.f32.mrf.mxu1  ;;  %v101_v53 = vadd.f32 %v215_v49, %v100_v51 }
  0xa9   :  { %v124_v56 = vadd.f32 %v123_v52, %v101_v53 }
  0xab   :  { %v147_v57 = vadd.f32 %v146_v54, %v124_v56 }
  0xad   :  { %v150_v59 = vmax.f32 %v147_v57, 0.0 }
  0xaf   :  { %209 = vmatpush.xpose.msk.msra.mxu3 %vm158_vm2, %v150_v59 }
  0xb3   :  { %210 = vmatpush.xpose.msk.msra.mxu3 %vm158_vm2, %v149_v60 }
  0xb6   :  { %211 = vmatmul.msk.f32.vlgmr.msra.gmra.mxu3 %vm158_vm2, %v151_v61 }
 0x139   :  { %v185_v63 = vpop.f32.mrf.mxu3 }
 0x13a   :  { %v186_v0 = vadd.f32 %v185_v63, %v156_v62 }
 0x13c   :  { %189 = vst.msk [vmem:[#allocation2] sm:$0xf] %vm188_vm3, %v186_v0 }
 0x13d   :  { %200 = dma.vmem_to_hbm [thread:$0]  %s196_s9, 64, %s198_s12, [#allocation3]  }
 0x13e   :  { %240 = dma.done.wait [#allocation3], 64  }
 0x13f   :  { %241 = vsyncadd [#allocation3], 4294967232 }
 0x140   :  { %205 = vsyncpa [#allocation3], 1 }

</bundles_post_ra>
